<compile_context>
chip_gen: v5e
topology: v5e:2x2
jax: 0.10.0
libtpu: 0.0.40
codegen_flags: <defaults>
</compile_context>

<pallas_src>
import jax
import jax.numpy as jnp
from jax.experimental import pallas as pl
from jax.experimental.pallas import tpu as pltpu


def _affine_kernel(scale_ref, shift_ref, x_ref, o_ref):
    # scale_ref, shift_ref: (NB, C, 1)   -- per-sample, per-channel affine params
    # x_ref, o_ref:         (NB, C, T)   -- lane-dense spatial tile
    o_ref[...] = x_ref[...] * scale_ref[...] + shift_ref[...]


def _pick_spatial_tile(hw, c, itemsize, max_tile_bytes=2 * 1024 * 1024):
    """Largest multiple-of-128 divisor of hw with a (C, T) tile <= max_tile_bytes.

    Falls back to the full spatial extent when hw is not a multiple of 128
    (block_shape == full array dim is always legal, just lane-sparse)."""
    if hw % 128 != 0:
        # TODO(synk): for tiny feature maps (<128 lanes) fold channels into the
        # lane dim in the wrapper to avoid masked partial stores.
        return hw
    best = 128
    t = 128
    while t <= hw:
        if hw % t == 0 and c * t * itemsize <= max_tile_bytes:
            best = t
        t += 128
    return best


def _pick_batch_block(n, tile_bytes, max_tile_bytes=4 * 1024 * 1024):
    """Largest divisor of n such that the blocked tile stays under budget."""
    best = 1
    for nb in range(1, n + 1):
        if n % nb == 0 and nb * tile_bytes <= max_tile_bytes:
            best = nb
    return best


def apply_style_id(x, latent, weight, bias):
    """x: (N, C, H, W), latent: (N, L), weight: (2C, L), bias: (2C,)."""
    N, C, H, W = x.shape
    HW = H * W

    # ---- style Linear hoisted to one proper MXU-shaped XLA matmul ----------
    style = jnp.dot(latent, weight.T, preferred_element_type=jnp.float32) \
            + bias.astype(jnp.float32)                       # (N, 2C)
    scale = style[:, :C].astype(x.dtype).reshape(N, C, 1)    # style[:, 0]
    shift = style[:, C:].astype(x.dtype).reshape(N, C, 1)    # style[:, 1]

    x_flat = x.reshape(N, C, HW)
    itemsize = jnp.dtype(x.dtype).itemsize

    # ---- tiling -------------------------------------------------------------
    T_HW = _pick_spatial_tile(HW, C, itemsize)
    n_spatial = HW // T_HW

    tile_bytes = C * T_HW * itemsize
    if n_spatial == 1:
        # Whole sample fits in one tile: amortize per-step overhead over batch.
        NB = _pick_batch_block(N, tile_bytes)
    else:
        NB = 1
    n_batch = N // NB

    out = pl.pallas_call(
        _affine_kernel,
        out_shape=jax.ShapeDtypeStruct((N, C, HW), x.dtype),
        grid_spec=pltpu.PrefetchScalarGridSpec(
            num_scalar_prefetch=0,
            grid=(n_batch, n_spatial),
            in_specs=[
                pl.BlockSpec((NB, C, 1), lambda b, s: (b, 0, 0)),      # scale
                pl.BlockSpec((NB, C, 1), lambda b, s: (b, 0, 0)),      # shift
                pl.BlockSpec((NB, C, T_HW), lambda b, s: (b, 0, s)),   # x tile
            ],
            out_specs=pl.BlockSpec((NB, C, T_HW), lambda b, s: (b, 0, s)),
        ),
        compiler_params=pltpu.CompilerParams(
            dimension_semantics=("parallel", "parallel"),
            vmem_limit_bytes=32 * 1024 * 1024,
        ),
    )(scale, shift, x_flat)

    return out.reshape(N, C, H, W)


def _reference(x, latent, weight, bias):
    # Plain-JAX reference of the PyTorch forward.
    N, C, H, W = x.shape
    style = latent @ weight.T + bias                  # (N, 2C)
    style = style.reshape(N, 2, C, 1, 1)
    return x * style[:, 0] + style[:, 1]


if __name__ == "__main__":
    # Small shapes consistent with the module: batch=2, channels=4, spatial=16,
    # latent_size=8.
    N, C, H, W = 2, 4, 16, 16
    L = 8

    key = jax.random.PRNGKey(0)
    kx, kl, kw, kb = jax.random.split(key, 4)

    x = jax.random.normal(kx, (N, C, H, W), dtype=jnp.float32)
    latent = jax.random.normal(kl, (N, L), dtype=jnp.float32)

    # Deterministic nn.Linear-style init: U(-1/sqrt(L), 1/sqrt(L)).
    bound = 1.0 / (L ** 0.5)
    weight = jax.random.uniform(kw, (2 * C, L), minval=-bound, maxval=bound,
                                dtype=jnp.float32)
    bias = jax.random.uniform(kb, (2 * C,), minval=-bound, maxval=bound,
                              dtype=jnp.float32)

    out = apply_style_id(x, latent, weight, bias)
    out = jax.block_until_ready(out)

    ref = _reference(x, latent, weight, bias)
    assert out.shape == (N, C, H, W)
    assert jnp.allclose(out, ref, atol=1e-5, rtol=1e-5), "mismatch vs reference"

    print("KERNEL_OK")
</pallas_src>

<mosaic_0001>
module attributes {stable_mosaic.version = 11 : i64} {
  func.func @_affine_kernel(%arg0: i32, %arg1: i32, %arg2: memref<2x4x1xf32, #tpu.memory_space<vmem>>, %arg3: memref<2x4x1xf32, #tpu.memory_space<vmem>>, %arg4: memref<2x4x256xf32, #tpu.memory_space<vmem>>, %arg5: memref<2x4x256xf32, #tpu.memory_space<vmem>>) attributes {dimension_semantics = [#tpu.dimension_semantics<parallel>, #tpu.dimension_semantics<parallel>], iteration_bounds = array<i64: 1, 1>, scalar_prefetch = 0 : i64, scratch_operands = 0 : i64, tpu.core_type = #tpu.core_type<tc>, window_params = [{transform_indices = @transform_0, window_bounds = array<i64: 2, 4, 1>}, {transform_indices = @transform_1, window_bounds = array<i64: 2, 4, 1>}, {transform_indices = @transform_2, window_bounds = array<i64: 2, 4, 256>}, {transform_indices = @transform_3, window_bounds = array<i64: 2, 4, 256>}]} {
    %c0 = arith.constant 0 : index
    %c0_0 = arith.constant 0 : index
    %c0_1 = arith.constant 0 : index
    %0 = vector.load %arg4[%c0, %c0_0, %c0_1] : memref<2x4x256xf32, #tpu.memory_space<vmem>>, vector<2x4x256xf32>
    %c0_2 = arith.constant 0 : index
    %c0_3 = arith.constant 0 : index
    %c0_4 = arith.constant 0 : index
    %1 = vector.load %arg2[%c0_2, %c0_3, %c0_4] : memref<2x4x1xf32, #tpu.memory_space<vmem>>, vector<2x4x1xf32>
    %2 = vector.broadcast %1 : vector<2x4x1xf32> to vector<2x4x256xf32>
    %3 = arith.mulf %0, %2 : vector<2x4x256xf32>
    %c0_5 = arith.constant 0 : index
    %c0_6 = arith.constant 0 : index
    %c0_7 = arith.constant 0 : index
    %4 = vector.load %arg3[%c0_5, %c0_6, %c0_7] : memref<2x4x1xf32, #tpu.memory_space<vmem>>, vector<2x4x1xf32>
    %5 = vector.broadcast %4 : vector<2x4x1xf32> to vector<2x4x256xf32>
    %6 = arith.addf %3, %5 : vector<2x4x256xf32>
    %c0_8 = arith.constant 0 : index
    %c0_9 = arith.constant 0 : index
    %c0_10 = arith.constant 0 : index
    %7 = vector.load %arg5[%c0_8, %c0_9, %c0_10] : memref<2x4x256xf32, #tpu.memory_space<vmem>>, vector<2x4x256xf32>
    tpu.vector_store %arg5[%c0_8, %c0_9, %c0_10], %6 {strides = array<i32>} : memref<2x4x256xf32, #tpu.memory_space<vmem>>, vector<2x4x256xf32>,
    return
  }
  func.func @transform_0(%arg0: i32, %arg1: i32) -> (i32, i32, i32) {
    %c0_i32 = arith.constant 0 : i32
    %c0_i32_0 = arith.constant 0 : i32
    %c0_i32_1 = arith.constant 0 : i32
    return %arg0, %c0_i32, %c0_i32_0 : i32, i32, i32
  }
  func.func @transform_1(%arg0: i32, %arg1: i32) -> (i32, i32, i32) {
    %c0_i32 = arith.constant 0 : i32
    %c0_i32_0 = arith.constant 0 : i32
    %c0_i32_1 = arith.constant 0 : i32
    return %arg0, %c0_i32, %c0_i32_0 : i32, i32, i32
  }
  func.func @transform_2(%arg0: i32, %arg1: i32) -> (i32, i32, i32) {
    %c0_i32 = arith.constant 0 : i32
    %c0_i32_0 = arith.constant 0 : i32
    return %arg0, %c0_i32, %arg1 : i32, i32, i32
  }
  func.func @transform_3(%arg0: i32, %arg1: i32) -> (i32, i32, i32) {
    %c0_i32 = arith.constant 0 : i32
    %c0_i32_0 = arith.constant 0 : i32
    return %arg0, %c0_i32, %arg1 : i32, i32, i32
  }
}

</mosaic_0001>

<bundles_post_ra>
// kernel: tpu_custom_call.1
= control target key start
LH: loop header
LB: loop body
LE: loop exit
PB: predicated region body
PF: predicated region fallthrough
CT: control target
= control target key end

     0   :  { %v114_v2 = vmov 0   ;;  %s160_s0 = inlined_call_operand.vmem [shape: f32[2,4,1], index: 0, kind: input, shape index: {}]   ;;  %s161_s1 = inlined_call_operand.vmem [shape: f32[2,4,1], index: 1, kind: input, shape index: {}]   ;;  %s162_s2 = inlined_call_operand.vmem [shape: f32[2,4,256], index: 2, kind: input, shape index: {}]   ;;  %s163_s3 = inlined_call_operand.hbm [shape: f32[2,4,256], index: 3, kind: output, shape index: {}]  }
   0x1   :  { %v39_v0 = vld [vmem:[%s161_s1] sm:$0xf]  ;;  %87 = vset.pattern.permute.xlu1 %v114_v2  ;;  %86 = vset.pattern.permute.xlu0 %v114_v2 }
   0x2   :  { %v17_v1 = vld [vmem:[%s160_s0] sm:$0xf]  ;;  %43 = vperm.xlu1 %87, %v39_v0  }
   0x3   :  { %21 = vperm.xlu0 %86, %v17_v1  }
   0x4   :  { %8 = vsyncpa [#allocation3], 0  ;;  %v40_v3 = vld [vmem:[%s161_s1 + $0x4] sm:$0xf]  ;;  %v115_v5 = vmov 839922192  }
   0x5   :  { %v18_v4 = vld [vmem:[%s160_s0 + $0x4] sm:$0xf]  ;;  %v28_v6 = vunpack.c.l.s4 %v115_v5  ;;  %v16_v17 = vld [vmem:[%s162_s2 + $0x8] sm:$0xff]  ;;  %s116_s22 = smov [#allocation2]   ;;  %s69_s26 = sshll.u32 %s163_s3, 4  ;;  %s70_s26 = int_to_ptr.hbm [resolvable:$true] %s69_s26 }
   0x6   :  { %v15_v10 = vld [vmem:[%s162_s2] sm:$0xff]  ;;  %s67_s23 = sshll.u32 %s116_s22, 4  ;;  %s117_s27 = smov 128   ;;  %s68_s23 = int_to_ptr.vmem [resolvable:$true] %s67_s23 }
   0x7   :  { %v29_v7 = vunpack.c.0.s8 %v28_v6  ;;  %s118_s28 = smov 8  }
   0xa   :  { %47 = vperm.xlu1 %87, %v40_v3  }
   0xb   :  { %25 = vperm.xlu0 %86, %v18_v4  }
  0x74   :  { %v44_v8 = vpop.permute.xlu1 %43 }
  0x75   :  { %v22_v9 = vpop.permute.xlu0 %21  ;;  %v52_v11 = vperm.slane %v44_v8, %v29_v7 }
  0x76   :  { %v30_v12 = vperm.slane %v22_v9, %v29_v7 }
  0x78   :  { %v37_v13 = vmul.f32 %v30_v12, %v15_v10 }
  0x7a   :  { %v59_v14 = vadd.f32 %v52_v11, %v37_v13 }
  0x7c   :  { %61 = vst [vmem:[#allocation2] sm:$0xff] %v59_v14  ;;  %v48_v15 = vpop.permute.xlu1 %47 }
  0x7d   :  { %v26_v16 = vpop.permute.xlu0 %25  ;;  %v56_v19 = vperm.slane %v48_v15, %v29_v7 }
  0x7e   :  { %v34_v18 = vperm.slane %v26_v16, %v29_v7 }
  0x80   :  { %v38_v20 = vmul.f32 %v34_v18, %v16_v17 }
  0x82   :  { %v60_v21 = vadd.f32 %v56_v19, %v38_v20 }
  0x84   :  { %62 = vst [vmem:[#allocation2 + $0x8] sm:$0xff] %v60_v21 }
  0x85   :  { %75 = dma.vmem_to_hbm [thread:$0]  %s68_s23, 256, %s70_s26, [#allocation3], %s117_s27, %s117_s27, %s118_s28  }
  0x86   :  { %112 = dma.done.wait [#allocation3], 256  }
  0x87   :  { %113 = vsyncadd [#allocation3], 4294967040 }
  0x88   :  { %80 = vsyncpa [#allocation3], 1 }

</bundles_post_ra>
